<compile_context>
chip_gen: v7x
topology: tpu7x:2x2x1
jax: 0.10.0
libtpu: 0.0.40
codegen_flags: <defaults>
</compile_context>

<pallas_src>
import functools

import jax
import jax.numpy as jnp
from jax.experimental import pallas as pl
from jax.experimental.pallas import tpu as pltpu

IGNORE_INDEX = 999


def _vmem_limit_bytes():
    """~70% of physical VMEM: ~44.8 MiB on v7x, ~89.6 MiB on v5e/v6e."""
    try:
        phys = pltpu.get_tpu_info().vmem_capacity_bytes
    except Exception:
        phys = 64 * 1024 * 1024          # conservative fallback (v7x-sized)
    return int(min(96 * 1024 * 1024, max(32 * 1024 * 1024, (phys * 7) // 10)))


def _pick_tile_n(n, c, in_itemsize, vmem_limit):
    """Rows per tile, sized against the VMEM limit with lane-padded accounting."""
    c_lanes = ((c + 127) // 128) * 128   # lane-padded class width in VMEM
    # per-row VMEM bytes:
    #   2x double-buffered native-dtype logits block (lane padded)
    #   ~4 live full-tile f32 temporaries (x_f32, exp, iota/onehot, select)
    #   2x double-buffered (tile_n, 1) int32 targets block (lane padded to 128)
    bytes_per_row = c_lanes * (2 * in_itemsize + 4 * 4) + 2 * 128 * 4
    budget = (vmem_limit * 5) // 8       # leave headroom for compiler scratch
    tile = budget // bytes_per_row
    tile = max(8, min(8192, tile))
    n_ceil8 = ((n + 7) // 8) * 8
    tile = min(tile, n_ceil8)
    return max(8, (tile // 8) * 8)


def _focal_tile_kernel(x_ref, t_ref, cw_ref, loss_ref, wsum_ref, *, gamma):
    """One grid step: a (TILE_N, C) block of rows -> two (1,1) partial sums.

    x_ref   : (TILE_N, C) logits, native dtype (cast to f32 in-kernel)
    t_ref   : (TILE_N, 1) int32 targets (padded / OOB rows carry IGNORE_INDEX)
    cw_ref  : (1, C) class weights
    loss_ref, wsum_ref : (1, 1) per-tile partial sums (own slot per grid step)
    """
    x = x_ref[...].astype(jnp.float32)          # (TN, C)
    tgt = t_ref[...]                            # (TN, 1) int32
    cw = cw_ref[...].astype(jnp.float32)        # (1, C)
    tn, c = x.shape

    # ---- full-tile work: softmax statistics + one-hot gathers only --------
    m = jnp.max(x, axis=-1, keepdims=True)            # (TN, 1)
    e = jnp.exp(x - m)                                 # (TN, C) single full exp
    sum_e = jnp.sum(e, axis=-1, keepdims=True)         # (TN, 1)

    col = jax.lax.broadcasted_iota(jnp.int32, (tn, c), 1)
    onehot = col == tgt                                # IGNORE_INDEX (>= C) never
                                                       # matches -> row drops out
    # gather-as-one-hot, selecting against literal 0.0 so garbage in unpadded
    # tail rows can never leak into the reductions
    x_t = jnp.sum(jnp.where(onehot, x, 0.0), axis=-1, keepdims=True)   # (TN, 1)
    w_t = jnp.sum(jnp.where(onehot, cw, 0.0), axis=-1, keepdims=True)  # (TN, 1)

    # ---- per-row (TILE_N, 1) column work only ------------------------------
    logpt_t = (x_t - m) - jnp.log(sum_e)               # log_softmax at target
    pt_t = jnp.exp(logpt_t)
    one_minus = jnp.maximum(1.0 - pt_t, 0.0)           # clamp: pt can round to 1

    g = float(gamma)
    if g == 0.0:
        focal = jnp.ones_like(one_minus)
    elif g == float(int(g)) and 1.0 <= g <= 8.0:
        focal = one_minus
        for _ in range(int(g) - 1):                    # repeated multiply, no pow
            focal = focal * one_minus
    else:
        focal = one_minus ** g

    # explicit valid-row mask: ignore_index, padded rows and out-of-bounds
    # tail rows (whose m / sum_e may be garbage) are zeroed before the sums
    valid = (tgt >= 0) & (tgt < c)                     # (TN, 1) bool
    loss_col = jnp.where(valid, -(w_t * focal * logpt_t), 0.0)
    w_col = jnp.where(valid, w_t, 0.0)

    loss_ref[...] = jnp.sum(loss_col, keepdims=True)   # (1, 1)
    wsum_ref[...] = jnp.sum(w_col, keepdims=True)      # (1, 1)


def _focal_nll_sums(logits2d, targets1d, class_weights, gamma):
    """Returns (sum of -w[t]*focal_logpt[t], sum of w[t]) over non-ignored rows."""
    n, c = logits2d.shape
    # IGNORE_INDEX works by "one-hot never matches"; it must not be a real class.
    assert c <= IGNORE_INDEX, "num classes must be <= ignore_index (999)"

    vmem_limit = _vmem_limit_bytes()
    in_itemsize = jnp.dtype(logits2d.dtype).itemsize
    tile_n = _pick_tile_n(n, c, in_itemsize, vmem_limit)
    n_tiles = pl.cdiv(n, tile_n)
    n_pad = n_tiles * tile_n

    # Only the tiny targets array is padded; logits stay untouched (tail rows of
    # the last block read out-of-bounds garbage which the valid mask zeroes).
    tgt = targets1d.reshape(-1, 1).astype(jnp.int32)
    if n_pad != n:
        tgt = jnp.pad(tgt, ((0, n_pad - n), (0, 0)),
                      constant_values=IGNORE_INDEX)
    cw2d = class_weights.reshape(1, c).astype(jnp.float32)

    kernel = functools.partial(_focal_tile_kernel, gamma=gamma)
    loss_parts, w_parts = pl.pallas_call(
        kernel,
        out_shape=(jax.ShapeDtypeStruct((n_tiles, 1, 1), jnp.float32),
                   jax.ShapeDtypeStruct((n_tiles, 1, 1), jnp.float32)),
        grid_spec=pltpu.PrefetchScalarGridSpec(
            num_scalar_prefetch=0,
            grid=(n_tiles,),
            in_specs=[
                pl.BlockSpec((tile_n, c), lambda i: (i, 0)),   # logits, native dtype
                pl.BlockSpec((tile_n, 1), lambda i: (i, 0)),   # targets
                pl.BlockSpec((1, c), lambda i: (0, 0)),        # class weights
            ],
            out_specs=[
                pl.BlockSpec((None, 1, 1), lambda i: (i, 0, 0)),
                pl.BlockSpec((None, 1, 1), lambda i: (i, 0, 0)),
            ],
        ),
        compiler_params=pltpu.CompilerParams(
            # each tile owns its output slot -> fully parallel, both v7x cores used
            dimension_semantics=("parallel",),
            vmem_limit_bytes=vmem_limit),
    )(logits2d, tgt, cw2d)

    return jnp.sum(loss_parts), jnp.sum(w_parts)


class FocalLoss:
    """JAX/Pallas port of the PyTorch FocalLoss module."""

    def __init__(self, class_weights=None, gamma=2, reduction='mean', weight=None):
        self.class_weights = (None if class_weights is None
                              else jnp.asarray(class_weights, jnp.float32))
        self.gamma = gamma
        # NOTE: `reduction` is stored but unused, exactly like the PyTorch module
        # (its nll_loss call always uses the default 'mean' reduction).
        self.reduction = reduction
        self.weight = weight

    def __call__(self, outputs, target):
        total = jnp.float32(0.0)
        tgt_flat = target.reshape(-1)
        for output in outputs:
            c = output.shape[-1]
            cw = (self.class_weights if self.class_weights is not None
                  else jnp.ones((c,), jnp.float32))
            logits2d = output.reshape(-1, c)          # free reshape, no dtype cast
            loss_sum, w_sum = _focal_nll_sums(logits2d, tgt_flat, cw, self.gamma)
            # NOTE: if every row is ignored, w_sum == 0 and this yields NaN,
            # matching PyTorch nll_loss 'mean' behavior.
            total = total + loss_sum / w_sum
        return self.weight * total if self.weight else total


def _reference(outputs, target, class_weights, gamma, weight):
    """Pure-JAX reference mirroring the PyTorch forward."""
    total = jnp.float32(0.0)
    for o in outputs:
        c = o.shape[-1]
        logpt = jax.nn.log_softmax(o.astype(jnp.float32), axis=2)
        pt = jnp.exp(logpt)
        logpt = (1.0 - pt) ** gamma * logpt
        lp = logpt.reshape(-1, c)
        t = target.reshape(-1)
        valid = t != IGNORE_INDEX
        t_safe = jnp.where(valid, t, 0)
        cw = (class_weights if class_weights is not None
              else jnp.ones((c,), jnp.float32))
        picked = jnp.take_along_axis(lp, t_safe[:, None], axis=1)[:, 0]
        w = cw[t_safe]
        num = jnp.sum(jnp.where(valid, -w * picked, 0.0))
        den = jnp.sum(jnp.where(valid, w, 0.0))
        total = total + num / den
    return weight * total if weight else total


if __name__ == "__main__":
    key = jax.random.PRNGKey(0)
    B, S, C = 2, 8, 8           # (batch, sequence, num_classes)
    NUM_OUTPUTS = 2             # the module loops over multiple outputs

    k1, k2, k3 = jax.random.split(key, 3)
    outputs = [
        jax.random.normal(k, (B, S, C), dtype=jnp.float32)
        for k in jax.random.split(k1, NUM_OUTPUTS)
    ]
    target = jax.random.randint(k2, (B, S), 0, C, dtype=jnp.int32)
    # exercise ignore_index=999 on a couple of positions
    target = target.at[0, 0].set(IGNORE_INDEX).at[1, 3].set(IGNORE_INDEX)

    # deterministic class weights (shape (C,), as the module's __init__ implies)
    class_weights = jnp.linspace(0.5, 1.5, C).astype(jnp.float32)

    loss_fn = FocalLoss(class_weights=list(map(float, class_weights)),
                        gamma=2, reduction='mean', weight=None)
    out = loss_fn(outputs, target)
    out = jax.block_until_ready(out)

    ref = _reference(outputs, target, class_weights, gamma=2.0, weight=None)
    assert jnp.allclose(out, ref, rtol=1e-5, atol=1e-5), (out, ref)

    print("KERNEL_OK")
</pallas_src>

<mosaic_0001>
module attributes {stable_mosaic.version = 11 : i64} {
  func.func @_focal_tile_kernel(%arg0: i32, %arg1: memref<16x8xf32, #tpu.memory_space<vmem>>, %arg2: memref<16x1xi32, #tpu.memory_space<vmem>>, %arg3: memref<1x8xf32, #tpu.memory_space<vmem>>, %arg4: memref<1x1x1xf32, #tpu.memory_space<vmem>>, %arg5: memref<1x1x1xf32, #tpu.memory_space<vmem>>) attributes {dimension_semantics = [#tpu.dimension_semantics<parallel>], iteration_bounds = array<i64: 1>, scalar_prefetch = 0 : i64, scratch_operands = 0 : i64, tpu.core_type = #tpu.core_type<tc>, window_params = [{transform_indices = @transform_0, window_bounds = array<i64: 16, 8>}, {transform_indices = @transform_1, window_bounds = array<i64: 16, 1>}, {pipeline_mode = #tpu.pipeline_mode<synchronous>, transform_indices = @transform_2, window_bounds = array<i64: 1, 8>}, {transform_indices = @transform_3, window_bounds = array<i64: 1, 1, 1>}, {transform_indices = @transform_4, window_bounds = array<i64: 1, 1, 1>}]} {
    %c0 = arith.constant 0 : index
    %c0_0 = arith.constant 0 : index
    %0 = vector.load %arg1[%c0, %c0_0] : memref<16x8xf32, #tpu.memory_space<vmem>>, vector<16x8xf32>
    %c0_1 = arith.constant 0 : index
    %c0_2 = arith.constant 0 : index
    %1 = vector.load %arg2[%c0_1, %c0_2] : memref<16x1xi32, #tpu.memory_space<vmem>>, vector<16x1xi32>
    %c0_3 = arith.constant 0 : index
    %c0_4 = arith.constant 0 : index
    %2 = vector.load %arg3[%c0_3, %c0_4] : memref<1x8xf32, #tpu.memory_space<vmem>>, vector<1x8xf32>
    %cst = arith.constant dense<0xFF800000> : vector<16xf32>
    %3 = vector.multi_reduction <maximumf>, %0, %cst [1] : vector<16x8xf32> to vector<16xf32>
    %4 = vector.shape_cast %3 : vector<16xf32> to vector<16x1xf32>
    %5 = vector.broadcast %4 : vector<16x1xf32> to vector<16x8xf32>
    %6 = arith.subf %0, %5 : vector<16x8xf32>
    %7 = math.exp %6 : vector<16x8xf32>
    %cst_5 = arith.constant dense<0.000000e+00> : vector<16xf32>
    %8 = vector.multi_reduction <add>, %7, %cst_5 [1] : vector<16x8xf32> to vector<16xf32>
    %9 = vector.shape_cast %8 : vector<16xf32> to vector<16x1xf32>
    %10 = tpu.iota {dimensions = array<i32: 1>} : vector<16x8xi32>
    %11 = vector.broadcast %1 : vector<16x1xi32> to vector<16x8xi32>
    %12 = arith.cmpi eq, %10, %11 : vector<16x8xi32>
    %cst_6 = arith.constant 0.000000e+00 : f32
    %13 = vector.broadcast %cst_6 : f32 to vector<16x8xf32>
    %14 = arith.select %12, %0, %13 : vector<16x8xi1>, vector<16x8xf32>
    %cst_7 = arith.constant dense<0.000000e+00> : vector<16xf32>
    %15 = vector.multi_reduction <add>, %14, %cst_7 [1] : vector<16x8xf32> to vector<16xf32>
    %16 = vector.shape_cast %15 : vector<16xf32> to vector<16x1xf32>
    %cst_8 = arith.constant 0.000000e+00 : f32
    %17 = vector.shape_cast %2 : vector<1x8xf32> to vector<1x8xf32>
    %18 = vector.broadcast %17 : vector<1x8xf32> to vector<16x8xf32>
    %19 = vector.broadcast %cst_8 : f32 to vector<16x8xf32>
    %20 = arith.select %12, %18, %19 : vector<16x8xi1>, vector<16x8xf32>
    %cst_9 = arith.constant dense<0.000000e+00> : vector<16xf32>
    %21 = vector.multi_reduction <add>, %20, %cst_9 [1] : vector<16x8xf32> to vector<16xf32>
    %22 = vector.shape_cast %21 : vector<16xf32> to vector<16x1xf32>
    %23 = arith.subf %16, %4 : vector<16x1xf32>
    %24 = math.log %9 : vector<16x1xf32>
    %25 = arith.subf %23, %24 : vector<16x1xf32>
    %26 = math.exp %25 : vector<16x1xf32>
    %cst_10 = arith.constant 1.000000e+00 : f32
    %27 = vector.broadcast %cst_10 : f32 to vector<16x1xf32>
    %28 = arith.subf %27, %26 : vector<16x1xf32>
    %cst_11 = arith.constant 0.000000e+00 : f32
    %29 = vector.broadcast %cst_11 : f32 to vector<16x1xf32>
    %30 = arith.maximumf %28, %29 : vector<16x1xf32>
    %31 = arith.mulf %30, %30 : vector<16x1xf32>
    %c0_i32 = arith.constant 0 : i32
    %32 = vector.broadcast %c0_i32 : i32 to vector<16x1xi32>
    %33 = arith.cmpi sge, %1, %32 : vector<16x1xi32>
    %c8_i32 = arith.constant 8 : i32
    %34 = vector.broadcast %c8_i32 : i32 to vector<16x1xi32>
    %35 = arith.cmpi slt, %1, %34 : vector<16x1xi32>
    %36 = arith.andi %33, %35 : vector<16x1xi1>
    %37 = arith.mulf %22, %31 : vector<16x1xf32>
    %38 = arith.mulf %37, %25 : vector<16x1xf32>
    %cst_12 = arith.constant 0.000000e+00 : f32
    %39 = vector.broadcast %cst_12 : f32 to vector<16x1xf32>
    %40 = arith.subf %39, %38 : vector<16x1xf32>
    %cst_13 = arith.constant 0.000000e+00 : f32
    %41 = vector.broadcast %cst_13 : f32 to vector<16x1xf32>
    %42 = arith.select %36, %40, %41 : vector<16x1xi1>, vector<16x1xf32>
    %cst_14 = arith.constant 0.000000e+00 : f32
    %43 = vector.broadcast %cst_14 : f32 to vector<16x1xf32>
    %44 = arith.select %36, %22, %43 : vector<16x1xi1>, vector<16x1xf32>
    %45 = vector.shape_cast %42 : vector<16x1xf32> to vector<1x16x1xf32>
    %cst_15 = arith.constant dense<0.000000e+00> : vector<1xf32>
    %46 = vector.multi_reduction <add>, %45, %cst_15 [1, 2] : vector<1x16x1xf32> to vector<1xf32>
    %47 = vector.shape_cast %46 : vector<1xf32> to vector<1x1x1xf32>
    %48 = vector.extract %47[0, 0, 0] : f32 from vector<1x1x1xf32>
    %49 = vector.broadcast %48 : f32 to vector<1x1xf32>
    %c0_16 = arith.constant 0 : index
    %c0_17 = arith.constant 0 : index
    %c0_18 = arith.constant 0 : index
    %50 = vector.load %arg4[%c0_16, %c0_17, %c0_18] : memref<1x1x1xf32, #tpu.memory_space<vmem>>, vector<1x1x1xf32>
    %51 = vector.shape_cast %50 : vector<1x1x1xf32> to vector<1x1xf32>
    %52 = vector.shape_cast %49 : vector<1x1xf32> to vector<1x1x1xf32>
    tpu.vector_store %arg4[%c0_16, %c0_17, %c0_18], %52 {strides = array<i32>} : memref<1x1x1xf32, #tpu.memory_space<vmem>>, vector<1x1x1xf32>,
    %53 = vector.shape_cast %44 : vector<16x1xf32> to vector<1x16x1xf32>
    %cst_19 = arith.constant dense<0.000000e+00> : vector<1xf32>
    %54 = vector.multi_reduction <add>, %53, %cst_19 [1, 2] : vector<1x16x1xf32> to vector<1xf32>
    %55 = vector.shape_cast %54 : vector<1xf32> to vector<1x1x1xf32>
    %56 = vector.extract %55[0, 0, 0] : f32 from vector<1x1x1xf32>
    %57 = vector.broadcast %56 : f32 to vector<1x1xf32>
    %c0_20 = arith.constant 0 : index
    %c0_21 = arith.constant 0 : index
    %c0_22 = arith.constant 0 : index
    %58 = vector.load %arg5[%c0_20, %c0_21, %c0_22] : memref<1x1x1xf32, #tpu.memory_space<vmem>>, vector<1x1x1xf32>
    %59 = vector.shape_cast %58 : vector<1x1x1xf32> to vector<1x1xf32>
    %60 = vector.shape_cast %57 : vector<1x1xf32> to vector<1x1x1xf32>
    tpu.vector_store %arg5[%c0_20, %c0_21, %c0_22], %60 {strides = array<i32>} : memref<1x1x1xf32, #tpu.memory_space<vmem>>, vector<1x1x1xf32>,
    return
  }
  func.func @transform_0(%arg0: i32) -> (i32, i32) {
    %c0_i32 = arith.constant 0 : i32
    %c0_i32_0 = arith.constant 0 : i32
    return %arg0, %c0_i32 : i32, i32
  }
  func.func @transform_1(%arg0: i32) -> (i32, i32) {
    %c0_i32 = arith.constant 0 : i32
    %c0_i32_0 = arith.constant 0 : i32
    return %arg0, %c0_i32 : i32, i32
  }
  func.func @transform_2(%arg0: i32) -> (i32, i32) {
    %c0_i32 = arith.constant 0 : i32
    %c0_i32_0 = arith.constant 0 : i32
    %c0_i32_1 = arith.constant 0 : i32
    return %c0_i32, %c0_i32_0 : i32, i32
  }
  func.func @transform_3(%arg0: i32) -> (i32, i32, i32) {
    %c0_i32 = arith.constant 0 : i32
    %c0_i32_0 = arith.constant 0 : i32
    %c0_i32_1 = arith.constant 0 : i32
    return %arg0, %c0_i32, %c0_i32_0 : i32, i32, i32
  }
  func.func @transform_4(%arg0: i32) -> (i32, i32, i32) {
    %c0_i32 = arith.constant 0 : i32
    %c0_i32_0 = arith.constant 0 : i32
    %c0_i32_1 = arith.constant 0 : i32
    return %arg0, %c0_i32, %c0_i32_0 : i32, i32, i32
  }
}

</mosaic_0001>

<bundles_post_ra>
// kernel: tpu_custom_call.1
= control target key start
LH: loop header
LB: loop body
LE: loop exit
PB: predicated region body
PF: predicated region fallthrough
CT: control target
= control target key end

     0   :  { %10 = vsyncpa [#allocation3], 0  ;;  %vm23_vm0 = vcmask 64512   ;;  %v236_v4 = vmov 0   ;;  %s323_s0 = inlined_call_operand.vmem [shape: f32[16,8], index: 0, kind: input, shape index: {}]   ;;  %s324_s1 = inlined_call_operand.vmem [shape: s32[16,1], index: 1, kind: input, shape index: {}]   ;;  %s325_s2 = inlined_call_operand.vmem [shape: f32[1,8], index: 2, kind: input, shape index: {}]   ;;  %s326_s3 = inlined_call_operand.hbm [shape: f32[1,1,1], index: 3, kind: output, shape index: {0}]   ;;  %s327_s4 = inlined_call_operand.hbm [shape: f32[1,1,1], index: 4, kind: output, shape index: {1}]  }
   0x1   :  { %v18_v0 = vld [vmem:[%s323_s0] sm:$0xff]  ;;  %v19_v1 = vld [vmem:[%s323_s0 + $0x8] sm:$0xff]  ;;  %174 = vset.pattern.permute.xlu1 %v236_v4  ;;  %175 = vset.pattern.permute.xlu0 %v236_v4 }
   0x2   :  { %v273_v2 = vld [vmem:[%s324_s1] sm:$0xff]  ;;  %v24_v3 = vsel %vm23_vm0, %v18_v0, -inf }
   0x3   :  { %11 = vsyncpa [#allocation5], 0  ;;  %25 = vmax.xlane.f32.xlu0 %v24_v3  ;;  %45 = vperm.xlu1 %174, %v273_v2   ;;  %v27_v5 = vsel %vm23_vm0, %v19_v1, -inf  ;;  %v281_v6 = vld [vmem:[%s324_s1 + $0x8] sm:$0xff]  ;;  %v42_v11 = vlaneseq  ;;  %v166_v24 = vld [vmem:[%s325_s2] ss:$0 sm:$0xff] }
   0x4   :  { %vm92_vm3 = vcmp.ge.s32.totalorder %v273_v2, 0  ;;  %vm94_vm4 = vcmp.lt.s32.totalorder %v273_v2, 8  ;;  %vm93_vm5 = vcmp.ge.s32.totalorder %v281_v6, 0  ;;  %vm95_vm6 = vcmp.lt.s32.totalorder %v281_v6, 8  ;;  %s237_s2 = smov [#allocation2]   ;;  %s238_s25 = smov [#allocation4]  }
   0x5   :  { %v43_v15 = vand.u32 127, %v42_v11  ;;  %vm96_vm7 = vmand %vm92_vm3, %vm94_vm4  ;;  %vm108_vm9 = vcmask 7168   ;;  %s144_s23 = sshll.u32 %s237_s2, 4  ;;  %vm122_vm10 = vcmask 0   ;;  %s154_s26 = sshll.u32 %s238_s25, 4  ;;  %s145_s23 = int_to_ptr.vmem [resolvable:$true] %s144_s23  ;;  %s155_s26 = int_to_ptr.vmem [resolvable:$true] %s154_s26 }
   0x6   :  { %vm97_vm8 = vmand %vm93_vm5, %vm95_vm6  ;;  %s188_s27 = scalar_lea.vmem %s145_s23, 16  ;;  %s192_s28 = scalar_lea.vmem %s145_s23, 32 }
   0x7   :  { %28 = vmax.xlane.f32.xlu0 %v27_v5  ;;  %48 = vperm.xlu1 %174, %v281_v6   ;;  %p189_p0 = scmp.ne.s32.totalorder %s145_s23, %s188_s27  ;;  %p193_p1 = scmp.lt.s32.totalorder %s145_s23, %s145_s23 }
   0x8   :  { %p194_p2 = scmp.lt.s32.totalorder %s192_s28, %s188_s27 }
   0xa   :  { %p195_p3 = por %p194_p2, %p193_p1 }
   0xc   :  { %p196_p4 = pnand %p195_p3, %p189_p0 }
  0x82   :  { %v46_v14 = vpop.permute.xlu1 %45 }
  0x83   :  { %vm50_vm1 = vcmp.eq.s32.totalorder %v43_v15, %v46_v14 }
  0x84   :  { %v52_v18 = vsel %vm50_vm1, %v18_v0, 0.0  ;;  %v66_v26 = vsel %vm50_vm1, %v166_v24, 0.0 }
  0x85   :  { %v54_v20 = vsel %vm23_vm0, %v52_v18, 0.0  ;;  %v68_v27 = vsel %vm23_vm0, %v66_v26, 0.0 }
  0x86   :  { %v49_v16 = vpop.permute.xlu1 %48 }
  0x87   :  { %vm51_vm2 = vcmp.eq.s32.totalorder %v43_v15, %v49_v16 }
  0x88   :  { %v53_v22 = vsel %vm51_vm2, %v19_v1, 0.0  ;;  %v67_v28 = vsel %vm51_vm2, %v166_v24, 0.0 }
  0x89   :  { %v57_v25 = vsel %vm23_vm0, %v53_v22, 0.0  ;;  %v71_v29 = vsel %vm23_vm0, %v67_v28, 0.0 }
  0x90   :  { %v26_v7 = vpop.xlane.xlu0 %25 }
  0x91   :  { %v30_v8 = vsub.f32 %v18_v0, %v26_v7 }
  0x93   :  { %v32_v9 = vmul.f32 1.442695, %v30_v8 }
  0x94   :  { %v29_v10 = vpop.xlane.xlu0 %28 }
  0x95   :  { %176 = vpow2.f32 %v32_v9  ;;  %v31_v12 = vsub.f32 %v19_v1, %v29_v10 }
  0x97   :  { %v34_v13 = vmul.f32 1.442695, %v31_v12 }
  0x99   :  { %178 = vpow2.f32 %v34_v13 }
  0x9f   :  { %v177_v17 = vpop.eup %176 }
  0xa0   :  { %v36_v19 = vsel %vm23_vm0, %v177_v17, 0.0 }
  0xa1   :  { %37 = vadd.xlane.f32.xlu0 %v36_v19 }
  0xa3   :  { %v179_v21 = vpop.eup %178 }
  0xa4   :  { %v39_v23 = vsel %vm23_vm0, %v179_v21, 0.0 }
  0xa5   :  { %55 = vadd.xlane.f32.xlu0 %v54_v20  ;;  %40 = vadd.xlane.f32.xlu1 %v39_v23 }
  0xa9   :  { %58 = vadd.xlane.f32.xlu0 %v57_v25 }
  0xad   :  { %69 = vadd.xlane.f32.xlu0 %v68_v27 }
  0xb1   :  { %72 = vadd.xlane.f32.xlu0 %v71_v29 }
 0x12e   :  { %v38_v30 = vpop.xlane.xlu0 %37 }
 0x12f   :  { %180 = vlog2.f32 %v38_v30 }
 0x132   :  { %v41_v31 = vpop.xlane.xlu1 %40  ;;  %v56_v32 = vpop.xlane.xlu0 %55 }
 0x133   :  { %182 = vlog2.f32 %v41_v31  ;;  %v74_v35 = vsub.f32 %v56_v32, %v26_v7 }
 0x136   :  { %v59_v36 = vpop.xlane.xlu0 %58 }
 0x137   :  { %v75_v41 = vsub.f32 %v59_v36, %v29_v10 }
 0x139   :  { %v181_v33 = vpop.eup %180 }
 0x13a   :  { %v77_v34 = vmul.f32 0.6931472, %v181_v33  ;;  %v70_v48 = vpop.xlane.xlu0 %69 }
 0x13b   :  { %v106_v1 = vsel %vm96_vm7, %v70_v48, 0.0 }
 0x13c   :  { %v80_v37 = vsub.f32 %v74_v35, %v77_v34  ;;  %v124_v4 = vsel %vm108_vm9, %v106_v1, 0.0 }
 0x13d   :  { %v183_v38 = vpop.eup %182 }
 0x13e   :  { %v79_v39 = vmul.f32 0.6931472, %v183_v38  ;;  %v82_v40 = vmul.f32 1.442695, %v80_v37  ;;  %v73_v55 = vpop.xlane.xlu0 %72 }
 0x13f   :  { %v107_v61 = vsel %vm97_vm8, %v73_v55, 0.0 }
 0x140   :  { %184 = vpow2.f32 %v82_v40  ;;  %v81_v42 = vsub.f32 %v75_v41, %v79_v39  ;;  %v125_v2 = vsel %vm108_vm9, %v107_v61, 0.0 }
 0x141   :  { %v126_v5 = vadd.f32 %v125_v2, %v124_v4 }
 0x142   :  { %v84_v43 = vmul.f32 1.442695, %v81_v42 }
 0x144   :  { %186 = vpow2.f32 %v84_v43 }
 0x14a   :  { %v185_v44 = vpop.eup %184 }
 0x14b   :  { %v86_v45 = vsub.f32 1.0, %v185_v44 }
 0x14d   :  { %v88_v46 = vmax.f32 %v86_v45, 0.0 }
 0x14e   :  { %v187_v47 = vpop.eup %186 }
 0x14f   :  { %v90_v49 = vmul.f32 %v88_v46, %v88_v46  ;;  %v87_v50 = vsub.f32 1.0, %v187_v47 }
 0x151   :  { %v98_v51 = vmul.f32 %v90_v49, %v70_v48  ;;  %v89_v52 = vmax.f32 %v87_v50, 0.0 }
 0x153   :  { %v100_v53 = vmul.f32 %v98_v51, %v80_v37  ;;  %v91_v54 = vmul.f32 %v89_v52, %v89_v52 }
 0x155   :  { %v102_v56 = vsub.f32 0.0, %v100_v53  ;;  %v99_v57 = vmul.f32 %v91_v54, %v73_v55 }
 0x157   :  { %v101_v58 = vmul.f32 %v99_v57, %v81_v42  ;;  %v104_v60 = vsel %vm96_vm7, %v102_v56, 0.0 }
 0x158   :  { %v109_v63 = vsel %vm108_vm9, %v104_v60, 0.0 }
 0x159   :  { %v103_v59 = vsub.f32 0.0, %v101_v58 }
 0x15b   :  { %v105_v62 = vsel %vm97_vm8, %v103_v59, 0.0 }
 0x15c   :  { %v110_v0 = vsel %vm108_vm9, %v105_v62, 0.0 }
 0x15d   :  { %v111_v3 = vadd.f32 %v110_v0, %v109_v63 }
 0x15f   :  { %112 = vadd.xlane.f32.xlu0 %v111_v3 }
 0x163   :  { %127 = vadd.xlane.f32.xlu0 %v126_v5 }
 0x1ec   :  { %v113_v7 = vpop.xlane.xlu0 %112 }
 0x1ed   :  { %v114_v6 = vrot.slane %v113_v7, 4 }
 0x1ef   :  { %v115_v8 = vadd.f32 %v114_v6, %v113_v7 }
 0x1f0   :  { %v128_v9 = vpop.xlane.xlu0 %127 }
 0x1f1   :  { %v116_v10 = vrot.slane %v115_v8, 2  ;;  %v129_v11 = vrot.slane %v128_v9, 4 }
 0x1f3   :  { %v130_v12 = vadd.f32 %v129_v11, %v128_v9  ;;  %v117_v13 = vadd.f32 %v116_v10, %v115_v8 }
 0x1f5   :  { %v131_v14 = vrot.slane %v130_v12, 2  ;;  %v118_v15 = vrot.slane %v117_v13, 1 }
 0x1f7   :  { %v132_v16 = vadd.f32 %v131_v14, %v130_v12  ;;  %v119_v17 = vadd.f32 %v118_v15, %v117_v13 }
 0x1f9   :  { %167 = vpush %v119_v17  ;;  %v133_v18 = vrot.slane %v132_v16, 1 }
 0x1fb   :  { %v134_v19 = vadd.f32 %v133_v18, %v132_v16 }
 0x1fd   :  { %169 = vpush %v134_v19 }
 0x22a   :  { %s168_s24 = spop %167 }
 0x22b   :  { %v121_v20 = vstv %s168_s24 }
 0x22c   :  { %123 = vst.msk [vmem:[#allocation2] sm:$0x1] %vm122_vm10, %v121_v20 }
 0x22d   :  { %199 = shalt.err (!%p196_p4)
}
 0x22e   :  { %s200_s5 = scalar_lea.hbm %s326_s3, 16 }
 0x22f   :  { %p201_p5 = scmp.ne.s32.totalorder %s326_s3, %s200_s5  ;;  %p204_p6 = scmp.lt.u32.totalorder %s200_s5, %s326_s3 }
 0x231   :  { %p206_p7 = pnand %p204_p6, %p201_p5 }
 0x233   :  { %209 = shalt.err (!%p206_p7)
}
 0x234   :  { %147 = dma.vmem_to_hbm [thread:$0]  %s145_s23, 16, %s326_s3, [#allocation3]  }
 0x235   :  { %s170_s12 = spop %169  ;;  %s210_s13 = scalar_lea.vmem %s155_s26, 16 }
 0x236   :  { %v136_v21 = vstv %s170_s12  ;;  %p211_p8 = scmp.ne.s32.totalorder %s155_s26, %s210_s13  ;;  %s214_s14 = scalar_lea.vmem %s155_s26, 32 }
 0x237   :  { %137 = vst.msk [vmem:[#allocation4] sm:$0x1] %vm122_vm10, %v136_v21  ;;  %p215_p9 = scmp.lt.s32.totalorder %s155_s26, %s155_s26  ;;  %p216_p10 = scmp.lt.s32.totalorder %s214_s14, %s210_s13 }
 0x239   :  { %p217_p11 = por %p216_p10, %p215_p9 }
 0x23b   :  { %p218_p12 = pnand %p217_p11, %p211_p8 }
 0x23d   :  { %221 = shalt.err (!%p218_p12)
}
 0x23e   :  { %s222_s17 = scalar_lea.hbm %s327_s4, 16 }
 0x23f   :  { %p223_p13 = scmp.ne.s32.totalorder %s327_s4, %s222_s17  ;;  %p226_p0 = scmp.lt.u32.totalorder %s222_s17, %s327_s4 }
 0x241   :  { %p228_p1 = pnand %p226_p0, %p223_p13 }
 0x243   :  { %231 = shalt.err (!%p228_p1)
}
 0x244   :  { %157 = dma.vmem_to_hbm [thread:$0]  %s155_s26, 16, %s327_s4, [#allocation5]  }
 0x245   :  { %232 = dma.done.wait [#allocation3], 16  }
 0x246   :  { %233 = vsyncadd [#allocation3], 4294967280 }
 0x247   :  { %234 = dma.done.wait [#allocation5], 16  }
 0x248   :  { %235 = vsyncadd [#allocation5], 4294967280 }
 0x249   :  { %164 = vsyncpa [#allocation3], 1 }
 0x24a   :  { %165 = vsyncpa [#allocation5], 1 }

</bundles_post_ra>
